<compile_context>
chip_gen: v7x
topology: tpu7x:2x2x1
jax: 0.10.0
libtpu: 0.0.40
codegen_flags: <defaults>
</compile_context>

<pallas_src>
import functools

import jax
import jax.numpy as jnp
from jax.experimental import pallas as pl
from jax.experimental.pallas import tpu as pltpu


def _pixel_loss_kernel(x_ref, t_ref, o_ref, acc_ref, *, thw, hw_total, masked):
    """Grid = (batch_tile, hw_tile). Accumulates sum_c(p*t) over HW tiles."""
    k = pl.program_id(1)
    nk = pl.num_programs(1)

    @pl.when(k == 0)
    def _init():
        acc_ref[...] = jnp.zeros_like(acc_ref)

    x = x_ref[...].astype(jnp.float32)   # (TB, C, THW)
    t = t_ref[...].astype(jnp.float32)   # (TB, C, THW)

    # Numerically-stable softmax over channels without materializing p:
    #   sum_c(p * t) == sum_c(e * t) / sum_c(e),   e = exp(x - max_c x)
    m = jnp.max(x, axis=1, keepdims=True)               # (TB, 1, THW)
    e = jnp.exp(x - m)                                   # (TB, C, THW)
    num = jnp.sum(e * t, axis=1)                         # (TB, THW)
    den = jnp.sum(e, axis=1)                             # (TB, THW)

    contrib = num * pl.reciprocal(den, approx=False)     # exact recip (VALU)

    if masked:
        # Ragged last HW tile: zero out lanes past the true H*W extent.
        # (Static Python flag -> no cost on the common divisible path.)
        col = jax.lax.broadcasted_iota(jnp.int32, contrib.shape, 1) + k * thw
        contrib = jnp.where(col < hw_total, contrib, 0.0)

    # Lane-parallel partial sums: only cheap elementwise VPU work per step.
    acc_ref[...] = acc_ref[...] + contrib

    @pl.when(k == nk - 1)
    def _finalize():
        # One cross-lane reduce per batch tile; per-sample sums, batch axis last.
        o_ref[...] = jnp.sum(acc_ref[...], axis=1)[None, None, :]   # (1, 1, TB)


def pixel_loss(inputs, targets, *, max_hw_tile=8192, target_block_bytes=2 << 20):
    """inputs, targets: (N, C, H, W) float arrays (f32 or bf16).

    Returns the scalar float32 soft pixel-wise loss.
    """
    N, C, H, W = inputs.shape
    HW = H * W

    # Reshape is metadata-only (contiguous): no HBM pass, and bf16 inputs are
    # passed through to the kernel untouched (kernel upcasts internally).
    x = inputs.reshape(N, C, HW)
    t = targets.reshape(N, C, HW)

    # ---- HW tiling (no padding copies):
    #   * HW <= max_hw_tile        -> single full-extent tile (always legal).
    #   * 128 | HW                 -> largest 128-multiple divisor <= max_hw_tile.
    #   * otherwise                -> 128-multiple tile + in-kernel mask on tail.
    max_hw_tile = max(128, (max_hw_tile // 128) * 128)
    needs_mask = False
    if HW <= max_hw_tile:
        thw = HW
        n_hw = 1
    elif HW % 128 == 0:
        thw = 128
        for cand in range(max_hw_tile, 127, -128):
            if HW % cand == 0:
                thw = cand
                break
        n_hw = HW // thw
    else:
        thw = max_hw_tile
        n_hw = pl.cdiv(HW, thw)
        needs_mask = True

    # ---- Batch tiling: tb divides N (no padded samples, no ragged reads),
    # sized so each input block is ~target_block_bytes, capped so v7x's two
    # TensorCores each get at least one batch tile (nb >= 2 when N >= 2).
    itemsize = jnp.dtype(inputs.dtype).itemsize
    bytes_per_sample = C * thw * itemsize
    tb_cap = max(1, min(64, target_block_bytes // max(1, bytes_per_sample)))
    if N >= 2:
        tb_cap = min(tb_cap, max(1, N // 2))
    tb = 1
    for d in range(int(tb_cap), 0, -1):
        if N % d == 0:
            tb = d
            break
    nb = N // tb

    # ---- Explicit scoped-VMEM budget: 2 inputs x 2 pipeline buffers + the
    # f32 temporaries (x, e, e*t) + accumulator + slack.  Explicit sizing keeps
    # full double-buffering even on v5e's 16 MiB default.
    in_block_bytes = tb * C * thw * itemsize
    f32_block_bytes = tb * C * thw * 4
    acc_bytes = tb * thw * 4
    vmem_est = 2 * 2 * in_block_bytes + 3 * f32_block_bytes + acc_bytes + (1 << 20)
    vmem_limit = int(min(max(vmem_est, 16 << 20), 48 << 20))

    kernel = functools.partial(
        _pixel_loss_kernel, thw=thw, hw_total=HW, masked=needs_mask
    )

    sums = pl.pallas_call(
        kernel,
        out_shape=jax.ShapeDtypeStruct((nb, 1, tb), jnp.float32),
        grid_spec=pltpu.PrefetchScalarGridSpec(
            num_scalar_prefetch=0,
            grid=(nb, n_hw),
            in_specs=[
                pl.BlockSpec((tb, C, thw), lambda b, k: (b, 0, k)),
                pl.BlockSpec((tb, C, thw), lambda b, k: (b, 0, k)),
            ],
            out_specs=pl.BlockSpec((1, 1, tb), lambda b, k: (b, 0, 0)),
            scratch_shapes=[pltpu.VMEM((tb, thw), jnp.float32)],
        ),
        compiler_params=pltpu.CompilerParams(
            # Batch axis is embarrassingly parallel (v7x megacore shards it);
            # HW axis is the reduction carried in acc_ref.
            dimension_semantics=("parallel", "arbitrary"),
            vmem_limit_bytes=vmem_limit,
        ),
    )(x, t)

    per_sample_sum = sums.reshape(nb * tb)[:N]          # sum_{c,h,w} p*t per sample
    return jnp.mean(1.0 - per_sample_sum / HW)


def pixel_loss_ref(inputs, targets):
    """Pure-JAX reference mirroring the PyTorch forward exactly."""
    p = jax.nn.softmax(inputs, axis=1)
    H, W = inputs.shape[2], inputs.shape[3]
    per_sample = 1.0 - jnp.sum(p * targets, axis=(1, 2, 3)) / (H * W)
    return jnp.mean(per_sample)


if __name__ == "__main__":
    # PixelLoss has no learnable parameters; deterministic toy inputs.
    N, C, H, W = 2, 4, 16, 16
    key = jax.random.PRNGKey(0)
    k_in, k_tg = jax.random.split(key)

    inputs = jax.random.normal(k_in, (N, C, H, W), dtype=jnp.float32)
    # Soft targets (per-pixel distributions over channels), like segmentation labels.
    targets = jax.nn.softmax(
        jax.random.normal(k_tg, (N, C, H, W), dtype=jnp.float32) * 3.0, axis=1
    )

    ref = jax.block_until_ready(pixel_loss_ref(inputs, targets))

    # f32 path: bit-for-bit-class accuracy against the f32 reference.
    loss = jax.block_until_ready(pixel_loss(inputs, targets))
    assert jnp.allclose(loss, ref, atol=1e-5, rtol=1e-5), (loss, ref)

    # bf16 path: halves HBM read traffic (kernel upcasts to f32 internally);
    # checked with a loose tolerance since the inputs themselves are rounded.
    loss_bf16 = jax.block_until_ready(
        pixel_loss(inputs.astype(jnp.bfloat16), targets.astype(jnp.bfloat16))
    )
    assert jnp.allclose(loss_bf16, ref, atol=3e-2), (loss_bf16, ref)

    print("KERNEL_OK")
</pallas_src>

<mosaic_0001>
module attributes {stable_mosaic.version = 11 : i64} {
  func.func @_pixel_loss_kernel(%arg0: i32, %arg1: i32, %arg2: memref<1x4x256xf32, #tpu.memory_space<vmem>>, %arg3: memref<1x4x256xf32, #tpu.memory_space<vmem>>, %arg4: memref<1x1x1xf32, #tpu.memory_space<vmem>>, %arg5: memref<1x256xf32, #tpu.memory_space<vmem>>) attributes {dimension_semantics = [#tpu.dimension_semantics<parallel>, #tpu.dimension_semantics<arbitrary>], iteration_bounds = array<i64: 2, 1>, scalar_prefetch = 0 : i64, scratch_operands = 1 : i64, tpu.core_type = #tpu.core_type<tc>, window_params = [{transform_indices = @transform_0, window_bounds = array<i64: 1, 4, 256>}, {transform_indices = @transform_1, window_bounds = array<i64: 1, 4, 256>}, {transform_indices = @transform_2, window_bounds = array<i64: 1, 1, 1>}]} {
    %c0_i32 = arith.constant 0 : i32
    %0 = arith.cmpi eq, %arg1, %c0_i32 : i32
    %1 = arith.extui %0 : i1 to i32
    %c0_i32_0 = arith.constant 0 : i32
    %2 = arith.cmpi ne, %1, %c0_i32_0 : i32
    scf.if %2 {
      %cst_14 = arith.constant 0.000000e+00 : f32
      %21 = vector.broadcast %cst_14 : f32 to vector<1x256xf32>
      %c0_15 = arith.constant 0 : index
      %c0_16 = arith.constant 0 : index
      %22 = vector.load %arg5[%c0_15, %c0_16] : memref<1x256xf32, #tpu.memory_space<vmem>>, vector<1x256xf32>
      tpu.vector_store %arg5[%c0_15, %c0_16], %21 {strides = array<i32>} : memref<1x256xf32, #tpu.memory_space<vmem>>, vector<1x256xf32>,
    } else {
    }
    %c0 = arith.constant 0 : index
    %c0_1 = arith.constant 0 : index
    %c0_2 = arith.constant 0 : index
    %3 = vector.load %arg2[%c0, %c0_1, %c0_2] : memref<1x4x256xf32, #tpu.memory_space<vmem>>, vector<1x4x256xf32>
    %c0_3 = arith.constant 0 : index
    %c0_4 = arith.constant 0 : index
    %c0_5 = arith.constant 0 : index
    %4 = vector.load %arg3[%c0_3, %c0_4, %c0_5] : memref<1x4x256xf32, #tpu.memory_space<vmem>>, vector<1x4x256xf32>
    %cst = arith.constant dense<0xFF800000> : vector<1x256xf32>
    %5 = vector.multi_reduction <maximumf>, %3, %cst [1] : vector<1x4x256xf32> to vector<1x256xf32>
    %6 = vector.shape_cast %5 : vector<1x256xf32> to vector<1x1x256xf32>
    %7 = vector.broadcast %6 : vector<1x1x256xf32> to vector<1x4x256xf32>
    %8 = arith.subf %3, %7 : vector<1x4x256xf32>
    %9 = math.exp %8 : vector<1x4x256xf32>
    %10 = arith.mulf %9, %4 : vector<1x4x256xf32>
    %cst_6 = arith.constant dense<0.000000e+00> : vector<1x256xf32>
    %11 = vector.multi_reduction <add>, %10, %cst_6 [1] : vector<1x4x256xf32> to vector<1x256xf32>
    %cst_7 = arith.constant dense<0.000000e+00> : vector<1x256xf32>
    %12 = vector.multi_reduction <add>, %9, %cst_7 [1] : vector<1x4x256xf32> to vector<1x256xf32>
    %13 = tpu.reciprocal %12 : vector<1x256xf32> -> vector<1x256xf32>
    %14 = arith.mulf %11, %13 : vector<1x256xf32>
    %c0_8 = arith.constant 0 : index
    %c0_9 = arith.constant 0 : index
    %15 = vector.load %arg5[%c0_8, %c0_9] : memref<1x256xf32, #tpu.memory_space<vmem>>, vector<1x256xf32>
    %16 = arith.addf %15, %14 : vector<1x256xf32>
    %c0_10 = arith.constant 0 : index
    %c0_11 = arith.constant 0 : index
    %17 = vector.load %arg5[%c0_10, %c0_11] : memref<1x256xf32, #tpu.memory_space<vmem>>, vector<1x256xf32>
    tpu.vector_store %arg5[%c0_10, %c0_11], %16 {strides = array<i32>} : memref<1x256xf32, #tpu.memory_space<vmem>>, vector<1x256xf32>,
    %c0_i32_12 = arith.constant 0 : i32
    %18 = arith.cmpi eq, %arg1, %c0_i32_12 : i32
    %19 = arith.extui %18 : i1 to i32
    %c0_i32_13 = arith.constant 0 : i32
    %20 = arith.cmpi ne, %19, %c0_i32_13 : i32
    scf.if %20 {
      %c0_14 = arith.constant 0 : index
      %c0_15 = arith.constant 0 : index
      %21 = vector.load %arg5[%c0_14, %c0_15] : memref<1x256xf32, #tpu.memory_space<vmem>>, vector<1x256xf32>
      %cst_16 = arith.constant dense<0.000000e+00> : vector<1xf32>
      %22 = vector.multi_reduction <add>, %21, %cst_16 [1] : vector<1x256xf32> to vector<1xf32>
      %23 = vector.shape_cast %22 : vector<1xf32> to vector<1x1x1xf32>
      %c0_17 = arith.constant 0 : index
      %c0_18 = arith.constant 0 : index
      %c0_19 = arith.constant 0 : index
      %24 = vector.load %arg4[%c0_17, %c0_18, %c0_19] : memref<1x1x1xf32, #tpu.memory_space<vmem>>, vector<1x1x1xf32>
      tpu.vector_store %arg4[%c0_17, %c0_18, %c0_19], %23 {strides = array<i32>} : memref<1x1x1xf32, #tpu.memory_space<vmem>>, vector<1x1x1xf32>,
    } else {
    }
    return
  }
  func.func @transform_0(%arg0: i32, %arg1: i32) -> (i32, i32, i32) {
    %c0_i32 = arith.constant 0 : i32
    %c0_i32_0 = arith.constant 0 : i32
    return %arg0, %c0_i32, %arg1 : i32, i32, i32
  }
  func.func @transform_1(%arg0: i32, %arg1: i32) -> (i32, i32, i32) {
    %c0_i32 = arith.constant 0 : i32
    %c0_i32_0 = arith.constant 0 : i32
    return %arg0, %c0_i32, %arg1 : i32, i32, i32
  }
  func.func @transform_2(%arg0: i32, %arg1: i32) -> (i32, i32, i32) {
    %c0_i32 = arith.constant 0 : i32
    %c0_i32_0 = arith.constant 0 : i32
    %c0_i32_1 = arith.constant 0 : i32
    return %arg0, %c0_i32, %c0_i32_0 : i32, i32, i32
  }
}

</mosaic_0001>

<bundles_post_ra>
// kernel: tpu_custom_call.1
= control target key start
LH: loop header
LB: loop body
LE: loop exit
PB: predicated region body
PF: predicated region fallthrough
CT: control target
= control target key end

     0   :  { %7 = vsyncpa [#allocation4], 0  ;;  %s844_s0 = inlined_call_operand.hbm [shape: f32[2,4,256], index: 0, kind: input, shape index: {}]   ;;  %s845_s1 = inlined_call_operand.hbm [shape: f32[2,4,256], index: 1, kind: input, shape index: {}]   ;;  %s846_s2 = inlined_call_operand.vmem [shape: f32[2,1,1], index: 2, kind: output, shape index: {}]  }
   0x1   :  { %9 = vsyncpa [#allocation4 + $0x1], 0 }
   0x2   :  { %10 = vsyncpa [#allocation6], 0 }
   0x3   :  { %12 = vsyncpa [#allocation6 + $0x1], 0  ;;  %s658_s9 = smov 0   ;;  %s660_s10 = smov 0  }
   0x4   :  { %s662_s11 = smov 0   ;;  %s664_s12 = smov 0  }
   0x5   :  { %s666_s13 = smov 0   ;;  %s668_s14 = smov 0  }
   0x6 LB: > { %s437_s15 = sadd.s32 4294967295, %s637_s14   ;;  %s30_s16 = sadd.s32 1, %s633_s13  ;;  %s637_s14 = sphi %s668_s14, %s18_s14   ;;  %s633_s13 = sphi %s666_s13, %s862_s13   ;;  %s629_s12 = sphi %s664_s12, %s861_s12   ;;  %s625_s11 = sphi %s662_s11, %s860_s11   ;;  %s621_s10 = sphi %s660_s10, %s859_s10   ;;  %s617_s9 = sphi %s658_s9, %s858_s9  }
   0x7   : > { %p32_p0 = scmp.ge.s32.totalorder %s30_s16, 2  ;;  %s39_s17 = sadd.s32 1, %s625_s11 }
   0x8   : > { %p46_p1 = scmp.ne.s32.totalorder %s625_s11, %s621_s10  ;;  %p47_p2 = scmp.eq.s32.totalorder %s637_s14, 0 }
   0x9   : > { %s864_s16 = smov (%p32_p0, %s30_s16), 0  ;;  %p52_p4 = scmp.ne.s32.totalorder %s621_s10, %s617_s9 }
   0xa   : > { %p694_p3 = por %p47_p2, %p46_p1  ;;  %s34_s19 = ssub.s32 %s633_s13, %s864_s16 }
   0xb   : > { %p53_p5 = scmp.eq.s32.totalorder %s437_s15, 0  ;;  %p37_p6 = scmp.eq.s32.totalorder %s34_s19, 0 }
   0xc   : > { %p465_p8 = scmp.lt.s32.totalorder %s637_s14, 2  ;;  %s710_s22 = sand.u32 1, %s625_s11  }
   0xd   : > { %p701_p7 = por %p53_p5, %p52_p4  ;;  %s452_s23 = sshll.u32 %s633_s13, 7 }
   0xe   : > { %s707_s21 = scalar_select %p37_p6, %s625_s11, %s39_s17  }
   0xf   : > { %s849_s20 = scalar_select %p701_p7, 1, 0 }
  0x10   : > { %s441_s24 = sshll.u32 %s710_s22, 3  ;;  %s719_s27 = scalar_lea.hbm %s844_s0, %s452_s23 }
  0x11   : > { %s134_s28 = scalar_lea.vmem [#allocation3], %s441_s24  ;;  %p725_p9 = pnand %p465_p8, %p694_p3 }
  0x12   : > { %s144_s29 = sshll.u32 %s134_s28, 4  ;;  %s131_s3 = scalar_lea.sflag [#allocation4], %s710_s22  ;;  %s729_s29 = int_to_ptr.vmem [resolvable:$true] %s144_s29 }
  0x13   : > { %s523_s4 = scalar_lea.hbm %s719_s27, 128  ;;  %p525_p13 = pneg %p725_p9 }
  0x14   : > { %p524_p12 = scmp.ne.s32.totalorder %s719_s27, %s523_s4  ;;  %s528_s7 = scalar_lea.hbm %s844_s0, 256 }
  0x15   : > { %p529_p2 = scmp.lt.u32.totalorder %s719_s27, %s844_s0  ;;  %p530_p3 = scmp.lt.u32.totalorder %s528_s7, %s523_s4 }
  0x16   : > { %p526_p0 = pnand %p525_p13, %p524_p12  ;;  %p532_p5 = scmp.lt.u32.totalorder %s523_s4, %s719_s27 }
  0x17   : > { %p531_p4 = por %p530_p3, %p529_p2 }
  0x18   : > { %p527_p1 = pneg %p526_p0 }
  0x19   : > { %p533_p6 = por %p532_p5, %p531_p4 }
  0x1b   : > { %p534_p8 = pnand %p533_p6, %p527_p1 }
  0x1d   : > { %537 = shalt.err (!%p534_p8)
}
  0x1e   : > { %s538_s15 = scalar_lea.vmem %s729_s29, 128  ;;  %s639_s17 = smov [#allocation3]  }
  0x1f   : > { %p539_p12 = scmp.ne.s32.totalorder %s729_s29, %s538_s15  ;;  %s543_s18 = sshll.u32 %s639_s17, 4  ;;  %s544_s18 = int_to_ptr.vmem [resolvable:$false] %s543_s18 }
  0x20   : > { %s545_s19 = scalar_lea.vmem %s544_s18, 256  ;;  %p546_p11 = scmp.lt.s32.totalorder %s729_s29, %s544_s18 }
  0x21   : > { %p541_p0 = pnand %p539_p12, %p525_p13  ;;  %p547_p2 = scmp.lt.s32.totalorder %s545_s19, %s538_s15 }
  0x23   : > { %p542_p10 = pneg %p541_p0  ;;  %p548_p3 = por %p547_p2, %p546_p11 }
  0x25   : > { %p549_p4 = pnand %p548_p3, %p542_p10 }
  0x27   : > { %552 = shalt.err (!%p549_p4)
}
  0x28   : > { %461 = dma.hbm_to_vmem [thread:$0]  (!%p725_p9), %s719_s27, 128, %s729_s29, %s131_s3  }
  0x29   : > { %p851_p1 = scmp.lt.s32.totalorder %s637_s14, 3  ;;  %p852_p5 = scmp.ge.s32.totalorder %s637_s14, 1 }
  0x2a   : > { %s772_s4 = scalar_lea.hbm %s845_s1, %s452_s23  ;;  %s155_s5 = scalar_lea.vmem [#allocation5], %s441_s24 }
  0x2b   : > { %p763_p6 = pnand %p852_p5, %p851_p1  ;;  %s165_s6 = sshll.u32 %s155_s5, 4  ;;  %s166_s6 = int_to_ptr.vmem [resolvable:$true] %s165_s6 }
  0x2c   : > { %s152_s27 = scalar_lea.sflag [#allocation6], %s710_s22  ;;  %s553_s29 = scalar_lea.hbm %s772_s4, 128 }
  0x2d   : > { %s853_s25 = scalar_select %p763_p6, 1, 0 }
  0x2e   : > { %p554_p10 = scmp.ne.s32.totalorder %s772_s4, %s553_s29  ;;  %s558_s23 = scalar_lea.hbm %s845_s1, 256 }
  0x2f   : > { %p559_p12 = scmp.lt.u32.totalorder %s772_s4, %s845_s1  ;;  %p560_p0 = scmp.lt.u32.totalorder %s558_s23, %s553_s29 }
  0x30   : > { %p556_p11 = pnand %p554_p10, %p525_p13  ;;  %p562_p3 = scmp.lt.u32.totalorder %s553_s29, %s772_s4 }
  0x31   : > { %p561_p2 = por %p560_p0, %p559_p12 }
  0x32   : > { %p557_p8 = pneg %p556_p11 }
  0x33   : > { %p563_p4 = por %p562_p3, %p561_p2 }
  0x35   : > { %p564_p1 = pnand %p563_p4, %p557_p8 }
  0x37   : > { %567 = shalt.err (!%p564_p1)
}
  0x38   : > { %s568_s22 = scalar_lea.vmem %s166_s6, 128  ;;  %s640_s24 = smov [#allocation5]  }
  0x39   : > { %p569_p5 = scmp.ne.s32.totalorder %s166_s6, %s568_s22  ;;  %s573_s15 = sshll.u32 %s640_s24, 4  ;;  %s574_s15 = int_to_ptr.vmem [resolvable:$false] %s573_s15 }
  0x3a   : > { %s575_s17 = scalar_lea.vmem %s574_s15, 256  ;;  %p576_p7 = scmp.lt.s32.totalorder %s166_s6, %s574_s15 }
  0x3b   : > { %p571_p10 = pnand %p569_p5, %p525_p13  ;;  %p577_p6 = scmp.lt.s32.totalorder %s575_s17, %s568_s22 }
  0x3d   : > { %p572_p11 = pneg %p571_p10  ;;  %p578_p0 = por %p577_p6, %p576_p7 }
  0x3f   : > { %p579_p12 = pnand %p578_p0, %p572_p11 }
  0x41   : > { %582 = shalt.err (!%p579_p12)
}
  0x42   : > { %464 = dma.hbm_to_vmem [thread:$0]  (!%p725_p9), %s772_s4, 128, %s166_s6, %s152_s27  }
  0x43   : > { %p854_p8 = scmp.ne.s32.totalorder %s853_s25, 0 }
  0x44   : > { %s176_s18 = sand.u32 (!%p854_p8), 1, %s621_s10   ;;  %p855_p13 = scmp.ne.s32.totalorder (!%p854_p8), %s849_s20, 0 }
  0x45   : > { %174 = sbr.rel (%p854_p8) target bundleno = 304 (0x130), region = 28  ;;  %s448_s19 = sshll.u32 (!%p854_p8), %s176_s18, 3 }
  0x46   : > { %s177_s26 = scalar_lea.sflag (!%p854_p8), [#allocation4], %s176_s18  ;;  %s180_s28 = scalar_lea.vmem (!%p854_p8), [#allocation3], %s448_s19 }
  0x4c   : > { %608 = dma.done.wait (%p855_p13), %s177_s26, 128  }
  0x4d   : > { %610 = vsyncadd (%p855_p13), %s177_s26, 4294967168  ;;  %s186_s5 = scalar_lea.sflag [#allocation6], %s176_s18  ;;  %s189_s29 = scalar_lea.vmem [#allocation5], %s448_s19 }
  0x4e   : > { %612 = dma.done.wait (%p855_p13), %s186_s5, 128  }
  0x4f   : > { %614 = vsyncadd (%p855_p13), %s186_s5, 4294967168  ;;  %v222_v0 = vlaneseq  ;;  %v641_v2 = vmov 0.0   ;;  %vm232_vm1 = vcmask 1043456   ;;  %v227_v3 = vld [vmem:[%s180_s28] sm:$0xff]  ;;  %v228_v22 = vld [vmem:[%s189_s29] sm:$0xff]  ;;  %vm333_vm2 = vcmask 1040384  }
  0x50   : > { %v230_v4 = vcombine.high %v227_v3, %v227_v3  ;;  %v233_v5 = vsel %vm232_vm1, %v227_v3, -inf  ;;  %v642_v53 = vmov 1966171168   ;;  %p215_p7 = scmp.lt.s32.totalorder %s629_s12, 1  ;;  %vm339_vm3 = vcmask 0  }
  0x51   : > { %vm807_vm0 = vcmp.lt.s32.totalorder %v222_v0, 256  ;;  %v234_v6 = vrot.slane %v233_v5, 4  ;;  %v298_v54 = vunpack.c.l.s4 %v642_v53  ;;  %v301_v58 = vshrl.u32 %v222_v0, 7 }
  0x52   : > { %226 = vst.msk [vmem:[#allocation2] sm:$0x3] %vm807_vm0, %v641_v2  ;;  %v240_v7 = vsel %vm232_vm1, %v230_v4, -inf  ;;  %s866_s12 = smov (!%p215_p7, %s629_s12), 1 }
  0x53   : > { %v235_v8 = vmax.f32 %v233_v5, %v234_v6  ;;  %v241_v9 = vrot.slane %v240_v7, 4  ;;  %v299_v57 = vunpack.c.0.s8 %v298_v54  ;;  %s217_s25 = scalar_lea.vmem %s846_s2, %s866_s12 }
  0x55   : > { %v236_v10 = vrot.slane %v235_v8, 2  ;;  %v242_v11 = vmax.f32 %v240_v7, %v241_v9  ;;  %v302_v63 = vsub.s32 %v299_v57, %v301_v58  ;;  %v325_v7 = vsub.s32 0, %v301_v58 }
  0x57   : > { %v237_v12 = vmax.f32 %v235_v8, %v236_v10  ;;  %v243_v13 = vrot.slane %v242_v11, 2  ;;  %v329_v8 = vsub.s32 1, %v301_v58 }
  0x59   : > { %v238_v14 = vrot.slane %v237_v12, 1  ;;  %v244_v15 = vmax.f32 %v242_v11, %v243_v13  ;;  %v293_v4 = vld [vmem:[#allocation2] sm:$0x3] }
  0x5b   : > { %v239_v16 = vmax.f32 %v237_v12, %v238_v14  ;;  %v245_v17 = vrot.slane %v244_v15, 1 }
  0x5d   : > { %v246_v18 = vmax.f32 %v244_v15, %v245_v17 }
  0x5f   : > { %v249_v19 = vcombine.low %v239_v16, %v246_v18 }
  0x61   : > { %v251_v20 = vsub.f32 %v227_v3, %v249_v19 }
  0x63   : > { %v252_v21 = vmul.f32 1.442695, %v251_v20 }
  0x65   : > { %517 = vpow2.f32 %v252_v21 }
  0x6f   : > { %v518_v23 = vpop.eup %517 }
  0x70   : > { %v254_v24 = vmul.f32 %v518_v23, %v228_v22  ;;  %v273_v25 = vcombine.high %v518_v23, %v518_v23  ;;  %v275_v26 = vsel %vm232_vm1, %v518_v23, 0.0 }
  0x71   : > { %v276_v27 = vrot.slane %v275_v26, 4 }
  0x72   : > { %v256_v28 = vcombine.high %v254_v24, %v254_v24  ;;  %v258_v29 = vsel %vm232_vm1, %v254_v24, 0.0  ;;  %v282_v30 = vsel %vm232_vm1, %v273_v25, 0.0 }
  0x73   : > { %v259_v31 = vrot.slane %v258_v29, 4  ;;  %v277_v32 = vadd.f32 %v276_v27, %v275_v26  ;;  %v283_v33 = vrot.slane %v282_v30, 4 }
  0x74   : > { %v265_v34 = vsel %vm232_vm1, %v256_v28, 0.0 }
  0x75   : > { %v260_v35 = vadd.f32 %v259_v31, %v258_v29  ;;  %v266_v36 = vrot.slane %v265_v34, 4  ;;  %v278_v37 = vrot.slane %v277_v32, 2  ;;  %v284_v38 = vadd.f32 %v283_v33, %v282_v30 }
  0x77   : > { %v267_v39 = vadd.f32 %v266_v36, %v265_v34  ;;  %v279_v40 = vadd.f32 %v278_v37, %v277_v32  ;;  %v285_v41 = vrot.slane %v284_v38, 2  ;;  %v261_v42 = vrot.slane %v260_v35, 2 }
  0x79   : > { %v280_v43 = vrot.slane %v279_v40, 1  ;;  %v286_v44 = vadd.f32 %v285_v41, %v284_v38  ;;  %v268_v45 = vrot.slane %v267_v39, 2  ;;  %v262_v48 = vadd.f32 %v261_v42, %v260_v35 }
  0x7b   : > { %v281_v46 = vadd.f32 %v280_v43, %v279_v40  ;;  %v287_v47 = vrot.slane %v286_v44, 1  ;;  %v269_v50 = vadd.f32 %v268_v45, %v267_v39  ;;  %v263_v51 = vrot.slane %v262_v48, 1 }
  0x7d   : > { %v288_v49 = vadd.f32 %v287_v47, %v286_v44  ;;  %519 = vrcp.f32 %v281_v46  ;;  %v270_v52 = vrot.slane %v269_v50, 1  ;;  %v264_v55 = vadd.f32 %v263_v51, %v262_v48 }
  0x7f   : > { %521 = vrcp.f32 %v288_v49  ;;  %v271_v56 = vadd.f32 %v270_v52, %v269_v50 }
  0x87   : > { %v520_v59 = vpop.eup %519 }
  0x88   : > { %v291_v60 = vmul.f32 %v520_v59, %v264_v55 }
  0x89   : > { %v522_v61 = vpop.eup %521 }
  0x8a   : > { %v292_v62 = vmul.f32 %v522_v61, %v271_v56 }
  0x8c   : > { %v296_v2 = vcombine.low %v291_v60, %v292_v62 }
  0x8e   : > { %v303_v3 = vrot.slane %v296_v2, %v302_v63 }
  0x90   : > { %v310_v5 = vrot.slane %v303_v3, %v302_v63 }
  0x92   : > { %v312_v6 = vadd.f32 %v310_v5, %v293_v4 }
  0x94   : > { %317 = vst.msk [vmem:[#allocation2] sm:$0x3] %vm807_vm0, %v312_v6 }
  0x9b   : > { %v321_v9 = vld [vmem:[#allocation2] sm:$0x3] }
  0x9c   : > { %v326_v0 = vrot.slane %v321_v9, %v325_v7  ;;  %v330_v10 = vrot.slane %v321_v9, %v329_v8 }
  0x9e   : > { %v334_v11 = vsel %vm333_vm2, %v326_v0, 0.0  ;;  %v335_v12 = vsel %vm333_vm2, %v330_v10, 0.0 }
  0x9f   : > { %v336_v13 = vadd.f32 %v335_v12, %v334_v11 }
  0xa1   : > { %337 = vadd.xlane.f32.xlu0 %v336_v13 }
 0x12e   : > { %v338_v14 = vpop.xlane.xlu0 %337 }
 0x12f   : > { %340 = vst.msk [vmem:[%s217_s25] sm:$0x1] %vm339_vm3, %v338_v14 }
 0x130 PF: > { %s18_s14 = sadd.s32 1, %s637_s14   ;;  %s858_s9 = smov %s621_s10 }
 0x131   : > { %p15_p9 = scmp.ge.s32.totalorder %s18_s14, 4   ;;  %s859_s10 = smov %s625_s11 }
 0x132   : > { %s860_s11 = smov %s707_s21  ;;  %s861_s12 = smov %s633_s13 }
 0x133   : > { %s862_s13 = smov %s864_s16  ;;  %17 = sbr.rel (!%p15_p9) target bundleno = 6 (0x6), region = 89 }
 0x13a   :  { %358 = vsyncpa [#allocation4], 1 }
 0x13b   :  { %360 = vsyncpa [#allocation4 + $0x1], 1 }
 0x13c   :  { %361 = vsyncpa [#allocation6], 1 }
 0x13d   :  { %363 = vsyncpa [#allocation6 + $0x1], 1 }

</bundles_post_ra>
